<compile_context>
chip_gen: v7x
topology: tpu7x:2x2x1
jax: 0.10.0
libtpu: 0.0.40
codegen_flags: <defaults>
</compile_context>

<pallas_src>
import functools

import jax
import jax.numpy as jnp
from jax.experimental import pallas as pl
from jax.experimental.pallas import tpu as pltpu


def _round_up(v, m):
    return ((v + m - 1) // m) * m


def _logreg_kernel(x_ref, w_ref, b_ref, o_ref, acc_ref):
    # x_ref: (TM, TK) bf16   w_ref: (TK, N_pad) bf16
    # b_ref: (1, N_pad) f32  o_ref: (TM, N_pad) f32
    # acc_ref: (TM, N_pad) f32 VMEM scratch (persists across the K axis)
    k = pl.program_id(1)

    @pl.when(k == 0)
    def _init():
        acc_ref[...] = jnp.zeros_like(acc_ref)

    acc_ref[...] += jnp.dot(
        x_ref[...], w_ref[...], preferred_element_type=jnp.float32
    )

    @pl.when(k == pl.num_programs(1) - 1)
    def _finalize():
        logits = acc_ref[...] + b_ref[...]            # bias broadcast over rows
        # numerically-stable softmax over dim=1 (padded lanes have bias -1e30)
        m = jnp.max(logits, axis=-1, keepdims=True)
        e = jnp.exp(logits - m)
        s = jnp.sum(e, axis=-1, keepdims=True)
        o_ref[...] = (e * pl.reciprocal(s, approx=False)).astype(o_ref.dtype)


@functools.partial(jax.jit, static_argnames=("tk",))
def logistic_regression_forward(x_nchw, weight, bias, *, tk=512):
    """x_nchw: (B, C, H, W); weight: (dim_in, dim_out); bias: (dim_out,)."""
    B = x_nchw.shape[0]
    dim_in, dim_out = weight.shape

    # Flatten exactly like x.view(-1, C*H*W) on an NCHW tensor.
    x2d = x_nchw.reshape(B, -1).astype(jnp.float32)

    # --- lane/sublane-dense padded shapes -----------------------------------
    N_pad = _round_up(dim_out, 128)                   # class dim -> 128 lanes
    K_pad = _round_up(dim_in, 128)
    TK = K_pad if K_pad <= tk else tk                 # K tile (multiple of 128)
    K_pad = _round_up(K_pad, TK)                      # make K divisible by TK
    TM = min(128, _round_up(B, 8))                    # row tile (multiple of 8)
    M_pad = _round_up(B, TM)

    # Zero-pad inputs / weights; padded bias lanes get -1e30 so exp() ~ 0.
    x_p = jnp.zeros((M_pad, K_pad), jnp.bfloat16)
    x_p = x_p.at[:B, :dim_in].set(x2d.astype(jnp.bfloat16))
    w_p = jnp.zeros((K_pad, N_pad), jnp.bfloat16)
    w_p = w_p.at[:dim_in, :dim_out].set(weight.astype(jnp.bfloat16))
    b_p = jnp.full((1, N_pad), -1e30, jnp.float32)
    b_p = b_p.at[0, :dim_out].set(bias.astype(jnp.float32))

    grid = (M_pad // TM, K_pad // TK)

    out_padded = pl.pallas_call(
        _logreg_kernel,
        out_shape=jax.ShapeDtypeStruct((M_pad, N_pad), jnp.float32),
        grid=grid,
        in_specs=[
            pl.BlockSpec((TM, TK), lambda i, k: (i, k)),     # x tiles (rows, K)
            pl.BlockSpec((TK, N_pad), lambda i, k: (k, 0)),  # weight K-stream
            pl.BlockSpec((1, N_pad), lambda i, k: (0, 0)),   # bias, loaded once
        ],
        out_specs=pl.BlockSpec((TM, N_pad), lambda i, k: (i, 0)),
        scratch_shapes=[pltpu.VMEM((TM, N_pad), jnp.float32)],
        compiler_params=pltpu.CompilerParams(
            dimension_semantics=("parallel", "arbitrary"),
            vmem_limit_bytes=32 * 1024 * 1024,
        ),
    )(x_p, w_p, b_p)

    # Strip batch/class padding.
    return out_padded[:B, :dim_out]


if __name__ == "__main__":
    # Small shapes consistent with the module: batch=2, channels=4, spatial=16
    B, C, H, W = 2, 4, 16, 16
    dim_in = C * H * W          # 1024
    dim_out = 10

    key = jax.random.PRNGKey(0)
    kx, kw, kb = jax.random.split(key, 3)

    x = jax.random.normal(kx, (B, C, H, W), dtype=jnp.float32)

    # Deterministic parameter init, matching nn.Linear's U(-1/sqrt(dim_in), 1/sqrt(dim_in))
    bound = 1.0 / (dim_in ** 0.5)
    weight = jax.random.uniform(kw, (dim_in, dim_out), jnp.float32, -bound, bound)
    bias = jax.random.uniform(kb, (dim_out,), jnp.float32, -bound, bound)

    out = logistic_regression_forward(x, weight, bias)
    out = jax.block_until_ready(out)

    # Sanity check against pure-JAX f32 reference (bf16 matmul inputs -> relaxed atol).
    ref = jax.nn.softmax(x.reshape(B, -1) @ weight + bias, axis=1)
    assert out.shape == (B, dim_out)
    assert jnp.allclose(out, ref, atol=5e-3), "mismatch vs reference"
    assert jnp.allclose(jnp.sum(out, axis=1), 1.0, atol=1e-5), "rows not normalized"

    print("KERNEL_OK")
</pallas_src>

<mosaic_0001>
module attributes {stable_mosaic.version = 11 : i64} {
  func.func @_logreg_kernel(%arg0: i32, %arg1: i32, %arg2: memref<8x512xbf16, #tpu.memory_space<vmem>>, %arg3: memref<512x128xbf16, #tpu.memory_space<vmem>>, %arg4: memref<1x128xf32, #tpu.memory_space<vmem>>, %arg5: memref<8x128xf32, #tpu.memory_space<vmem>>, %arg6: memref<8x128xf32, #tpu.memory_space<vmem>>) attributes {dimension_semantics = [#tpu.dimension_semantics<parallel>, #tpu.dimension_semantics<arbitrary>], iteration_bounds = array<i64: 1, 2>, scalar_prefetch = 0 : i64, scratch_operands = 1 : i64, tpu.core_type = #tpu.core_type<tc>, window_params = [{transform_indices = @transform_0, window_bounds = array<i64: 8, 512>}, {transform_indices = @transform_1, window_bounds = array<i64: 512, 128>}, {pipeline_mode = #tpu.pipeline_mode<synchronous>, transform_indices = @transform_2, window_bounds = array<i64: 1, 128>}, {transform_indices = @transform_3, window_bounds = array<i64: 8, 128>}]} {
    %c0_i32 = arith.constant 0 : i32
    %0 = arith.cmpi eq, %arg1, %c0_i32 : i32
    %1 = arith.extui %0 : i1 to i32
    %c0_i32_0 = arith.constant 0 : i32
    %2 = arith.cmpi ne, %1, %c0_i32_0 : i32
    scf.if %2 {
      %cst_9 = arith.constant 0.000000e+00 : f32
      %12 = vector.broadcast %cst_9 : f32 to vector<8x128xf32>
      %c0_10 = arith.constant 0 : index
      %c0_11 = arith.constant 0 : index
      %13 = vector.load %arg6[%c0_10, %c0_11] : memref<8x128xf32, #tpu.memory_space<vmem>>, vector<8x128xf32>
      tpu.vector_store %arg6[%c0_10, %c0_11], %12 {strides = array<i32>} : memref<8x128xf32, #tpu.memory_space<vmem>>, vector<8x128xf32>,
    } else {
    }
    %c0 = arith.constant 0 : index
    %c0_1 = arith.constant 0 : index
    %3 = vector.load %arg6[%c0, %c0_1] : memref<8x128xf32, #tpu.memory_space<vmem>>, vector<8x128xf32>
    %c0_2 = arith.constant 0 : index
    %c0_3 = arith.constant 0 : index
    %4 = vector.load %arg2[%c0_2, %c0_3] : memref<8x512xbf16, #tpu.memory_space<vmem>>, vector<8x512xbf16>
    %c0_4 = arith.constant 0 : index
    %c0_5 = arith.constant 0 : index
    %5 = vector.load %arg3[%c0_4, %c0_5] : memref<512x128xbf16, #tpu.memory_space<vmem>>, vector<512x128xbf16>
    %cst = arith.constant dense<0.000000e+00> : vector<8x128xf32>
    %6 = tpu.matmul %4, %5, %cst {dimension_numbers = #tpu.dot_dimension_numbers<[1], [0], [0], [1], [0, 0, 1, 1], [], []>} : vector<8x512xbf16>, vector<512x128xbf16>, vector<8x128xf32> -> vector<8x128xf32>
    %7 = arith.addf %3, %6 : vector<8x128xf32>
    %c0_6 = arith.constant 0 : index
    %c0_7 = arith.constant 0 : index
    %8 = vector.load %arg6[%c0_6, %c0_7] : memref<8x128xf32, #tpu.memory_space<vmem>>, vector<8x128xf32>
    tpu.vector_store %arg6[%c0_6, %c0_7], %7 {strides = array<i32>} : memref<8x128xf32, #tpu.memory_space<vmem>>, vector<8x128xf32>,
    %c1_i32 = arith.constant 1 : i32
    %9 = arith.cmpi eq, %arg1, %c1_i32 : i32
    %10 = arith.extui %9 : i1 to i32
    %c0_i32_8 = arith.constant 0 : i32
    %11 = arith.cmpi ne, %10, %c0_i32_8 : i32
    scf.if %11 {
      %c0_9 = arith.constant 0 : index
      %c0_10 = arith.constant 0 : index
      %12 = vector.load %arg6[%c0_9, %c0_10] : memref<8x128xf32, #tpu.memory_space<vmem>>, vector<8x128xf32>
      %c0_11 = arith.constant 0 : index
      %c0_12 = arith.constant 0 : index
      %13 = vector.load %arg4[%c0_11, %c0_12] : memref<1x128xf32, #tpu.memory_space<vmem>>, vector<1x128xf32>
      %14 = vector.broadcast %13 : vector<1x128xf32> to vector<8x128xf32>
      %15 = arith.addf %12, %14 : vector<8x128xf32>
      %cst_13 = arith.constant dense<0xFF800000> : vector<8xf32>
      %16 = vector.multi_reduction <maximumf>, %15, %cst_13 [1] : vector<8x128xf32> to vector<8xf32>
      %17 = vector.shape_cast %16 : vector<8xf32> to vector<8x1xf32>
      %18 = vector.broadcast %17 : vector<8x1xf32> to vector<8x128xf32>
      %19 = arith.subf %15, %18 : vector<8x128xf32>
      %20 = math.exp %19 : vector<8x128xf32>
      %cst_14 = arith.constant dense<0.000000e+00> : vector<8xf32>
      %21 = vector.multi_reduction <add>, %20, %cst_14 [1] : vector<8x128xf32> to vector<8xf32>
      %22 = vector.shape_cast %21 : vector<8xf32> to vector<8x1xf32>
      %23 = tpu.reciprocal %22 : vector<8x1xf32> -> vector<8x1xf32>
      %24 = vector.broadcast %23 : vector<8x1xf32> to vector<8x128xf32>
      %25 = arith.mulf %20, %24 : vector<8x128xf32>
      %c0_15 = arith.constant 0 : index
      %c0_16 = arith.constant 0 : index
      %26 = vector.load %arg5[%c0_15, %c0_16] : memref<8x128xf32, #tpu.memory_space<vmem>>, vector<8x128xf32>
      tpu.vector_store %arg5[%c0_15, %c0_16], %25 {strides = array<i32>} : memref<8x128xf32, #tpu.memory_space<vmem>>, vector<8x128xf32>,
    } else {
    }
    return
  }
  func.func @transform_0(%arg0: i32, %arg1: i32) -> (i32, i32) {
    %c0_i32 = arith.constant 0 : i32
    return %arg0, %arg1 : i32, i32
  }
  func.func @transform_1(%arg0: i32, %arg1: i32) -> (i32, i32) {
    %c0_i32 = arith.constant 0 : i32
    %c0_i32_0 = arith.constant 0 : i32
    return %arg1, %c0_i32 : i32, i32
  }
  func.func @transform_2(%arg0: i32, %arg1: i32) -> (i32, i32) {
    %c0_i32 = arith.constant 0 : i32
    %c0_i32_0 = arith.constant 0 : i32
    %c0_i32_1 = arith.constant 0 : i32
    return %c0_i32, %c0_i32_0 : i32, i32
  }
  func.func @transform_3(%arg0: i32, %arg1: i32) -> (i32, i32) {
    %c0_i32 = arith.constant 0 : i32
    %c0_i32_0 = arith.constant 0 : i32
    return %arg0, %c0_i32 : i32, i32
  }
}

</mosaic_0001>

<bundles_post_ra>
// kernel: logistic_regression_forward.1
= control target key start
LH: loop header
LB: loop body
LE: loop exit
PB: predicated region body
PF: predicated region fallthrough
CT: control target
= control target key end

     0   :  { %s884_s12 = smov 0   ;;  %s886_s13 = smov 0   ;;  %s967_s0 = inlined_call_operand.vmem [shape: bf16[8,1024], index: 0, kind: input, shape index: {}]   ;;  %s968_s1 = inlined_call_operand.vmem [shape: bf16[1024,128], index: 1, kind: input, shape index: {}]   ;;  %s969_s2 = inlined_call_operand.vmem [shape: f32[1,128], index: 2, kind: input, shape index: {}]   ;;  %s970_s3 = inlined_call_operand.vmem [shape: f32[8,128], index: 3, kind: output, shape index: {}]  }
   0x1   :  { %s888_s14 = smov 0  }
   0x2 LB: > { %s22_s15 = sadd.s32 1, %s857_s13  ;;  %p683_p0 = scmp.ge.s32.totalorder %s861_s14, 1  ;;  %s861_s14 = sphi %s888_s14, %s13_s14   ;;  %s857_s13 = sphi %s886_s13, %s972_s13   ;;  %s853_s12 = sphi %s884_s12, %s971_s12  }
   0x3   : > { %p23_p1 = scmp.ge.s32.totalorder %s22_s15, 2  ;;  %p167_p2 = scmp.lt.s32.totalorder %s861_s14, 3 }
   0x5   : > { %s974_s15 = smov (%p23_p1, %s22_s15), 0  ;;  %p168_p3 = pnand %p683_p0, %p167_p2 }
   0x6   : > { %s684_s16 = sshll.u32 (!%p168_p3), %s853_s12, 2  ;;  %s686_s17 = sshll.u32 (!%p168_p3), %s853_s12, 6 }
   0x7   : > { %171 = sbr.rel (%p168_p3) target bundleno = 601 (0x259), region = 32  ;;  %p202_p4 = scmp.lt.s32.totalorder (!%p168_p3), %s684_s16, 7 }
   0x8   : > { %p210_p5 = scmp.lt.s32.totalorder (!%p168_p3), %s686_s17, 127  ;;  %p688_p6 = scmp.ne.s32.totalorder (!%p168_p3), %s853_s12, 0 }
   0xe   : > { %s976_s16 = smov (!%p202_p4, %s684_s16), 7  ;;  %s978_s17 = smov (!%p210_p5, %s686_s17), 127 }
   0xf   : > { %s685_s18 = sshll.u32 %s976_s16, 2  ;;  %s687_s22 = sshll.u32 %s978_s17, 2  ;;  %v863_v0 = vmov (!%p688_p6), 0.0  }
  0x10   : > { %s909_s21 = scalar_lea.vmem %s967_s0, %s685_s18  ;;  %s914_s25 = scalar_lea.vmem %s968_s1, %s687_s22  ;;  %224 = vst [vmem:[#allocation2] sm:$0xff] (!%p688_p6), %v863_v0 }
  0x11   : > { %223 = sbr.rel (%p688_p6) target bundleno = 24 (0x18), region = 36 }
  0x18 PF: > { %v799_v1 = vld [vmem:[%s914_s25 + $0x40] sm:$0xff]   ;;  %v803_v5 = vld [vmem:[%s914_s25 + $0x48] sm:$0xff]   ;;  %v807_v9 = vld [vmem:[%s914_s25 + $0x50] sm:$0xff]   ;;  %p725_p7 = scmp.ne.s32.totalorder %s853_s12, 1 }
  0x19   : > { %v800_v2 = vld [vmem:[%s914_s25 + $0xc0] sm:$0xff]   ;;  %730 = vmatprep.subr.bf16.mxu0 %v799_v1  ;;  %v804_v6 = vld [vmem:[%s914_s25 + $0xc8] sm:$0xff]   ;;  %v808_v10 = vld [vmem:[%s914_s25 + $0xd0] sm:$0xff]  }
  0x1a   : > { %v801_v3 = vld [vmem:[%s914_s25] sm:$0xff]   ;;  %752 = vmatprep.subr.bf16.mxu1 %v800_v2  ;;  %v805_v7 = vld [vmem:[%s914_s25 + $0x8] sm:$0xff]   ;;  %v809_v11 = vld [vmem:[%s914_s25 + $0x10] sm:$0xff]  }
  0x1b   : > { %v802_v4 = vld [vmem:[%s914_s25 + $0x80] sm:$0xff]   ;;  %731 = vmatpush3.bf16.msra.mxu0 %v801_v3  ;;  %v806_v8 = vld [vmem:[%s914_s25 + $0x88] sm:$0xff]   ;;  %v810_v12 = vld [vmem:[%s914_s25 + $0x90] sm:$0xff]  }
  0x1c   : > { %753 = vmatpush3.bf16.msra.mxu1 %v802_v4  ;;  %732 = vmatprep.subr.bf16.mxu0 %v803_v5  ;;  %v811_v13 = vld [vmem:[%s914_s25 + $0x58] sm:$0xff]   ;;  %v815_v17 = vld [vmem:[%s914_s25 + $0x60] sm:$0xff]   ;;  %v819_v21 = vld [vmem:[%s914_s25 + $0x68] sm:$0xff]  }
  0x1d   : > { %754 = vmatprep.subr.bf16.mxu1 %v804_v6  ;;  %v812_v14 = vld [vmem:[%s914_s25 + $0xd8] sm:$0xff]   ;;  %v816_v18 = vld [vmem:[%s914_s25 + $0xe0] sm:$0xff]   ;;  %v820_v22 = vld [vmem:[%s914_s25 + $0xe8] sm:$0xff]  }
  0x1e   : > { %v813_v15 = vld [vmem:[%s914_s25 + $0x18] sm:$0xff]   ;;  %v817_v19 = vld [vmem:[%s914_s25 + $0x20] sm:$0xff]   ;;  %v821_v23 = vld [vmem:[%s914_s25 + $0x28] sm:$0xff]  }
  0x1f   : > { %733 = vmatpush3.bf16.msra.mxu0 %v805_v7  ;;  %v814_v16 = vld [vmem:[%s914_s25 + $0x98] sm:$0xff]   ;;  %v818_v20 = vld [vmem:[%s914_s25 + $0xa0] sm:$0xff]   ;;  %v822_v24 = vld [vmem:[%s914_s25 + $0xa8] sm:$0xff]  }
  0x20   : > { %755 = vmatpush3.bf16.msra.mxu1 %v806_v8  ;;  %734 = vmatprep.subr.bf16.mxu0 %v807_v9  ;;  %v823_v25 = vld [vmem:[%s914_s25 + $0x70] sm:$0xff]   ;;  %v827_v29 = vld [vmem:[%s914_s25 + $0x78] sm:$0xff]   ;;  %v226_v33 = vld [vmem:[%s909_s21] sm:$0xff] }
  0x21   : > { %756 = vmatprep.subr.bf16.mxu1 %v808_v10  ;;  %v824_v26 = vld [vmem:[%s914_s25 + $0xf0] sm:$0xff]   ;;  %v828_v30 = vld [vmem:[%s914_s25 + $0xf8] sm:$0xff]   ;;  %v227_v34 = vld [vmem:[%s909_s21 + $0x8] sm:$0xff]  ;;  %v689_v35 = vcombine.low %v226_v33, %v226_v33  ;;  %v690_v36 = vcombine.high %v226_v33, %v226_v33 }
  0x22   : > { %v825_v27 = vld [vmem:[%s914_s25 + $0x30] sm:$0xff]   ;;  %v829_v31 = vld [vmem:[%s914_s25 + $0x38] sm:$0xff]   ;;  %v691_v37 = vcombine.low %v227_v34, %v227_v34  ;;  %v692_v38 = vcombine.high %v227_v34, %v227_v34  ;;  %v225_v47 = vld [vmem:[#allocation2] sm:$0xff] }
  0x23   : > { %735 = vmatpush3.bf16.msra.mxu0 %v809_v11  ;;  %v826_v28 = vld [vmem:[%s914_s25 + $0xb0] sm:$0xff]   ;;  %v830_v32 = vld [vmem:[%s914_s25 + $0xb8] sm:$0xff]   ;;  %530 = vmatprep.mubr.bf16.mxu0 %v690_v36  ;;  %v726_v53 = vld [vmem:[%s969_s2] ss:$0 sm:$0xff] (!%p725_p7) }
  0x24   : > { %757 = vmatpush3.bf16.msra.mxu1 %v810_v12  ;;  %736 = vmatprep.subr.bf16.mxu0 %v811_v13 }
  0x25   : > { %758 = vmatprep.subr.bf16.mxu1 %v812_v14  ;;  %570 = vmatprep.mubr.bf16.mxu1 %v692_v38 }
  0x27   : > { %737 = vmatpush3.bf16.msra.mxu0 %v813_v15 }
  0x28   : > { %759 = vmatpush3.bf16.msra.mxu1 %v814_v16  ;;  %738 = vmatprep.subr.bf16.mxu0 %v815_v17 }
  0x29   : > { %760 = vmatprep.subr.bf16.mxu1 %v816_v18 }
  0x2b   : > { %739 = vmatpush3.bf16.msra.mxu0 %v817_v19 }
  0x2c   : > { %761 = vmatpush3.bf16.msra.mxu1 %v818_v20  ;;  %740 = vmatprep.subr.bf16.mxu0 %v819_v21 }
  0x2d   : > { %762 = vmatprep.subr.bf16.mxu1 %v820_v22 }
  0x2f   : > { %741 = vmatpush3.bf16.msra.mxu0 %v821_v23 }
  0x30   : > { %763 = vmatpush3.bf16.msra.mxu1 %v822_v24  ;;  %742 = vmatprep.subr.bf16.mxu0 %v823_v25 }
  0x31   : > { %764 = vmatprep.subr.bf16.mxu1 %v824_v26 }
  0x33   : > { %743 = vmatpush3.bf16.msra.mxu0 %v825_v27 }
  0x34   : > { %765 = vmatpush3.bf16.msra.mxu1 %v826_v28  ;;  %744 = vmatprep.subr.bf16.mxu0 %v827_v29 }
  0x35   : > { %766 = vmatprep.subr.bf16.mxu1 %v828_v30 }
  0x37   : > { %745 = vmatpush3.bf16.msra.mxu0 %v829_v31 }
  0x38   : > { %767 = vmatpush3.bf16.msra.mxu1 %v830_v32 }
  0x3a   : > { %531 = vmatmul.mubr.bf16.vlgmr.msra.gmra.mrb[0].mxu0 %v689_v35 }
  0x3b   : > { %571 = vmatmul.mubr.bf16.vlgmr.msra.gmra.mrb[0].mxu1 %v691_v37 }
 0x10d   : > { %v746_v39 = vpop.f32.mrb[0].mxu0 }
 0x10e   : > { %v768_v40 = vpop.f32.mrb[0].mxu1  ;;  %v747_v41 = vpop.f32.mrb[1].mxu0 }
 0x10f   : > { %v769_v42 = vpop.f32.mrb[1].mxu1  ;;  %v748_v43 = vadd.f32 %v747_v41, %v746_v39  ;;  %v749_v45 = vpop.f32.mrb[2].mxu0 }
 0x110   : > { %v770_v44 = vadd.f32 %v769_v42, %v768_v40  ;;  %v771_v46 = vpop.f32.mrb[2].mxu1  ;;  %v750_v48 = vpop.f32.mrb[3].mxu0  ;;  %583 = sbr.rel (%p725_p7) target bundleno = 601 (0x259), region = 40 }
 0x111   : > { %v772_v49 = vpop.f32.mrb[3].mxu1 }
 0x112   : > { %v573_v50 = vadd.f32 %v770_v44, %v748_v43 }
 0x114   : > { %v578_v51 = vadd.f32 %v573_v50, %v225_v47 }
 0x116   : > { %579 = vst [vmem:[#allocation2] sm:$0xff] %v578_v51 }
 0x11d   : > { %v584_v52 = vld [vmem:[#allocation2] sm:$0xff] }
 0x11e   : > { %v592_v54 = vadd.f32 %v726_v53, %v584_v52 }
 0x120   : > { %593 = vmax.xlane.f32.xlu0 %v592_v54 }
 0x1ad   : > { %v594_v55 = vpop.xlane.xlu0 %593 }
 0x1ae   : > { %v595_v56 = vsub.f32 %v592_v54, %v594_v55 }
 0x1b0   : > { %v596_v57 = vmul.f32 1.442695, %v595_v56 }
 0x1b2   : > { %835 = vpow2.f32 %v596_v57 }
 0x1bc   : > { %v836_v58 = vpop.eup %835 }
 0x1bd   : > { %598 = vadd.xlane.f32.xlu0 %v836_v58 }
 0x24a   : > { %v599_v59 = vpop.xlane.xlu0 %598 }
 0x24b   : > { %837 = vrcp.f32 %v599_v59 }
 0x255   : > { %v838_v60 = vpop.eup %837 }
 0x256   : > { %v601_v61 = vmul.f32 %v838_v60, %v836_v58 }
 0x258   : > { %602 = vst [vmem:[%s970_s3] sm:$0xff] %v601_v61 }
 0x259 PF: > { %s13_s14 = sadd.s32 1, %s861_s14   ;;  %s971_s12 = smov %s857_s13 }
 0x25a   : > { %p10_p8 = scmp.ge.s32.totalorder %s13_s14, 4   ;;  %s972_s13 = smov %s974_s15 }
 0x25c   :  { %12 = sbr.rel (!%p10_p8) target bundleno = 2 (0x2), region = 73 }

</bundles_post_ra>
